<compile_context>
chip_gen: v7x
topology: tpu7x:2x2x1
jax: 0.10.0
libtpu: 0.0.40
codegen_flags: <defaults>
</compile_context>

<pallas_src>
import functools

import jax
import jax.numpy as jnp
from jax import lax
from jax.experimental import pallas as pl
from jax.experimental.pallas import tpu as pltpu


_TARGET_BLOCK_BYTES = 2 * 1024 * 1024   # ~2 MiB per array per block (v5e-safe)
_MAX_BLOCK_ROWS = 512                   # roofline plateau; also bounds kernel unroll
_VMEM_LIMIT_BYTES = 32 * 1024 * 1024    # explicit scoped-VMEM budget (all generations)
_FALLBACK_LANES = 1024                  # lane width for the ragged-prefix path


# ---------------------------------------------------------------------------
# Core math (pure jnp; used inside the kernels and for tiny XLA tails)
# ---------------------------------------------------------------------------
def _focal_core(x, t, *, gamma, alpha):
    """Numerically stable sigmoid focal loss, elementwise, float32 in/out."""
    e = jnp.exp(-jnp.abs(x))                      # shared exp (EUP)
    inv = 1.0 / (1.0 + e)                         # exact reciprocal (free: mem-bound)
    sig = jnp.where(x >= 0.0, inv, e * inv)       # sigmoid(x), stable both signs
    # BCE with logits, stable form: max(x,0) - x*t + log1p(exp(-|x|))
    bce = jnp.maximum(x, 0.0) - x * t + jnp.log1p(e)
    pt = (1.0 - sig) * t + sig * (1.0 - t)
    g = float(gamma)
    if g == 2.0:                                  # trace-time constant fold
        mod = pt * pt
    elif g == 1.0:
        mod = pt
    elif g == 0.0:
        mod = jnp.ones_like(pt)
    else:
        mod = jnp.power(pt, jnp.float32(g))
    # alpha*t + (1-alpha)*(1-t) == (1-alpha) + (2*alpha-1)*t   (folded)
    alpha_w = (1.0 - alpha) + (2.0 * alpha - 1.0) * t
    return bce * alpha_w * mod


# ---------------------------------------------------------------------------
# Kernels
# ---------------------------------------------------------------------------
def _focal_elem_kernel(pred_ref, tgt_ref, out_ref, *, gamma, alpha):
    loss = _focal_core(pred_ref[...].astype(jnp.float32),
                       tgt_ref[...].astype(jnp.float32),
                       gamma=gamma, alpha=alpha)
    out_ref[...] = loss.astype(out_ref.dtype)


def _focal_psum_kernel(pred_ref, tgt_ref, psum_ref, *, gamma, alpha,
                       rows, tile_r, lanes, nb):
    loss = _focal_core(pred_ref[...].astype(jnp.float32),
                       tgt_ref[...].astype(jnp.float32),
                       gamma=gamma, alpha=alpha)

    def partial_tile(x):
        # (tile_r, lanes) -> (8, 128) partial sums via vreg-aligned adds only.
        if tile_r % 8 == 0 and tile_r >= 8:
            acc = x[0:8, :]
            for a in range(1, tile_r // 8):          # sublane-tile fold (VPU adds)
                acc = acc + x[a * 8:(a + 1) * 8, :]
            out = acc[:, 0:128]
            for b in range(1, lanes // 128):         # lane-tile fold (VPU adds)
                out = out + acc[:, b * 128:(b + 1) * 128]
            return out
        # Tiny single-block case (rows < 8 / not a multiple of 8): scalar reduce,
        # placed at [0, 0] of the (8, 128) tile so the outer jnp.sum stays exact.
        s = jnp.sum(x)
        r = lax.broadcasted_iota(jnp.int32, (8, 128), 0)
        c = lax.broadcasted_iota(jnp.int32, (8, 128), 1)
        return jnp.where((r == 0) & (c == 0), s, jnp.float32(0.0))

    if rows % tile_r == 0:
        # Exact grid: no masking work at all.
        psum_ref[...] = partial_tile(loss)
    else:
        i = pl.program_id(0)
        valid_last = rows - (nb - 1) * tile_r        # block-local valid row count

        @pl.when(i < nb - 1)
        def _():
            psum_ref[...] = partial_tile(loss)

        @pl.when(i == nb - 1)
        def _():
            row = lax.broadcasted_iota(jnp.int32, (tile_r, lanes), 0)
            psum_ref[...] = partial_tile(jnp.where(row < valid_last, loss, 0.0))


# ---------------------------------------------------------------------------
# Tiling helpers
# ---------------------------------------------------------------------------
def _pick_lanes(total):
    """Largest lane width (multiple of 128) that divides `total`, else None."""
    for c in (2048, 1024, 512, 256, 128):
        if total % c == 0:
            return c
    return None


def _pick_rows(rows, lanes, max_block_rows=None):
    by_bytes = max(8, (_TARGET_BLOCK_BYTES // (lanes * 4)) // 8 * 8)
    cap = min(_MAX_BLOCK_ROWS, by_bytes)
    if max_block_rows is not None:
        cap = min(cap, max(8, (max_block_rows // 8) * 8))
    if rows <= cap:
        return rows, 1                               # single full-array block
    return cap, -(-rows // cap)                      # multiple of 8, cdiv grid


# ---------------------------------------------------------------------------
# pallas_call wrappers
# ---------------------------------------------------------------------------
def _elem_call(p2, t2, gamma, alpha, out_dtype, max_block_rows=None):
    rows, lanes = p2.shape
    tile_r, nb = _pick_rows(rows, lanes, max_block_rows)
    kernel = functools.partial(_focal_elem_kernel,
                               gamma=float(gamma), alpha=float(alpha))
    return pl.pallas_call(
        kernel,
        out_shape=jax.ShapeDtypeStruct((rows, lanes), out_dtype),
        grid=(nb,),
        in_specs=[pl.BlockSpec((tile_r, lanes), lambda i: (i, 0)),
                  pl.BlockSpec((tile_r, lanes), lambda i: (i, 0))],
        out_specs=pl.BlockSpec((tile_r, lanes), lambda i: (i, 0)),
        compiler_params=pltpu.CompilerParams(
            dimension_semantics=("parallel",),
            vmem_limit_bytes=_VMEM_LIMIT_BYTES),
    )(p2, t2)


def _psum_call(p2, t2, gamma, alpha, max_block_rows=None):
    rows, lanes = p2.shape
    tile_r, nb = _pick_rows(rows, lanes, max_block_rows)
    kernel = functools.partial(_focal_psum_kernel,
                               gamma=float(gamma), alpha=float(alpha),
                               rows=rows, tile_r=tile_r, lanes=lanes, nb=nb)
    psum = pl.pallas_call(
        kernel,
        out_shape=jax.ShapeDtypeStruct((nb * 8, 128), jnp.float32),
        grid=(nb,),
        in_specs=[pl.BlockSpec((tile_r, lanes), lambda i: (i, 0)),
                  pl.BlockSpec((tile_r, lanes), lambda i: (i, 0))],
        out_specs=pl.BlockSpec((8, 128), lambda i: (i, 0)),
        compiler_params=pltpu.CompilerParams(
            dimension_semantics=("parallel",),
            vmem_limit_bytes=_VMEM_LIMIT_BYTES),
    )(p2, t2)
    return jnp.sum(psum)


def _focal_elementwise_pallas(pred, target, gamma, alpha, *,
                              lanes=None, max_block_rows=None):
    """Elementwise focal loss, same shape as `pred` (original, un-transposed layout)."""
    shape = pred.shape
    total = int(pred.size)
    out_dtype = pred.dtype if jnp.issubdtype(pred.dtype, jnp.floating) else jnp.float32
    flat_p = pred.reshape(-1)
    flat_t = target.reshape(-1)
    lanes_sel = _pick_lanes(total) if lanes is None else lanes

    if lanes_sel is None:
        # No multiple of 128 divides total: Pallas on the aligned prefix, tiny
        # (<1024-elem) tail in plain XLA.  No full-tensor pad / output slice.
        main = (total // _FALLBACK_LANES) * _FALLBACK_LANES
        parts = []
        if main:
            parts.append(
                _elem_call(flat_p[:main].reshape(-1, _FALLBACK_LANES),
                           flat_t[:main].reshape(-1, _FALLBACK_LANES),
                           gamma, alpha, out_dtype, max_block_rows).reshape(-1))
        if main < total:
            tail = _focal_core(flat_p[main:].astype(jnp.float32),
                               flat_t[main:].astype(jnp.float32),
                               gamma=gamma, alpha=alpha).astype(out_dtype)
            parts.append(tail)
        out = parts[0] if len(parts) == 1 else jnp.concatenate(parts)
        return out.reshape(shape)

    p2 = flat_p.reshape(-1, lanes_sel)               # free reshape, no copy
    t2 = flat_t.reshape(-1, lanes_sel)
    out = _elem_call(p2, t2, gamma, alpha, out_dtype, max_block_rows)
    return out.reshape(shape)


def _focal_sum_pallas(pred, target, gamma, alpha, *,
                      lanes=None, max_block_rows=None):
    """Global sum of the elementwise focal loss (no full-loss HBM writeback)."""
    total = int(pred.size)
    flat_p = pred.reshape(-1)
    flat_t = target.reshape(-1)
    lanes_sel = _pick_lanes(total) if lanes is None else lanes

    if lanes_sel is None:
        main = (total // _FALLBACK_LANES) * _FALLBACK_LANES
        tail_sum = jnp.sum(_focal_core(flat_p[main:].astype(jnp.float32),
                                       flat_t[main:].astype(jnp.float32),
                                       gamma=gamma, alpha=alpha))
        if main == 0:
            return tail_sum, total
        main_sum = _psum_call(flat_p[:main].reshape(-1, _FALLBACK_LANES),
                              flat_t[:main].reshape(-1, _FALLBACK_LANES),
                              gamma, alpha, max_block_rows)
        return main_sum + tail_sum, total

    p2 = flat_p.reshape(-1, lanes_sel)
    t2 = flat_t.reshape(-1, lanes_sel)
    return _psum_call(p2, t2, gamma, alpha, max_block_rows), total


# ---------------------------------------------------------------------------
# Module wrapper (matches the PyTorch FocalLoss forward semantics)
# ---------------------------------------------------------------------------
class FocalLossPallas:
    """JAX/Pallas equivalent of the PyTorch FocalLoss module (sigmoid focal loss)."""

    def __init__(self, gamma=2.0, alpha=0.25, reduction='mean', loss_weight=1.0):
        self.gamma = gamma
        self.alpha = alpha
        self.reduction = reduction
        self.loss_weight = loss_weight

    def __call__(self, pred, target, weight=None, avg_factor=None,
                 reduction_override=None):
        assert reduction_override in (None, 'none', 'mean', 'sum')
        assert pred.shape == target.shape, \
            'pred and target should be in the same shape.'
        reduction = reduction_override if reduction_override else self.reduction
        if target.dtype != pred.dtype:               # reference: target.type_as(pred)
            target = target.astype(pred.dtype)

        # Fused fast path: unweighted global reduction (transpose-invariant), so the
        # reference transpose(1, 0) copy is skipped and only per-block partial sums
        # are written to HBM.
        if weight is None and reduction in ('mean', 'sum'):
            total_sum, count = _focal_sum_pallas(pred, target, self.gamma, self.alpha)
            if reduction == 'mean':
                denom = avg_factor if avg_factor is not None else count
                return self.loss_weight * (total_sum / denom)
            if avg_factor is not None:
                raise ValueError('avg_factor can not be used with reduction="sum"')
            return self.loss_weight * total_sum

        # Weighted global reduction on 2-D pred: reduction is transpose-invariant,
        # so weight along the original axis 1 and fuse multiply+reduce in XLA.
        if weight is not None and reduction in ('mean', 'sum') and pred.ndim == 2:
            assert weight.ndim == 1
            # TODO(synk): fuse the per-sample weight multiply + reduction into the
            #             partial-sum kernel (single HBM read pass).
            loss = _focal_elementwise_pallas(pred, target, self.gamma, self.alpha)
            ws = jnp.sum(loss.astype(jnp.float32) * weight.astype(jnp.float32)[None, :])
            if reduction == 'mean':
                denom = avg_factor if avg_factor is not None else int(loss.size)
                return self.loss_weight * (ws / denom)
            if avg_factor is not None:
                raise ValueError('avg_factor can not be used with reduction="sum"')
            return self.loss_weight * ws

        # General / elementwise path: follow the reference layout literally.
        # TODO(synk): fuse the transpose into the output BlockSpec for the 'none' path.
        loss = _focal_elementwise_pallas(pred, target, self.gamma, self.alpha)
        loss = jnp.swapaxes(loss, 0, 1)
        if weight is not None:
            assert weight.ndim == 1
            w = weight.astype(jnp.float32)
            if pred.ndim > 1:
                w = w.reshape(-1, 1)
            loss = loss * w
        if avg_factor is None:
            if reduction == 'mean':
                loss = loss.mean()
            elif reduction == 'sum':
                loss = loss.sum()
        else:
            if reduction == 'mean':
                loss = loss.sum() / avg_factor
            elif reduction != 'none':
                raise ValueError('avg_factor can not be used with reduction="sum"')
        return self.loss_weight * loss


# ---------------------------------------------------------------------------
# Pure-JAX reference (mirrors the PyTorch forward: transpose(1,0) then focal loss)
# ---------------------------------------------------------------------------
def _reference_jnp(pred, target, gamma=2.0, alpha=0.25):
    p = jnp.swapaxes(pred, 0, 1).astype(jnp.float32)
    t = jnp.swapaxes(target, 0, 1).astype(jnp.float32)
    ps = jax.nn.sigmoid(p)
    pt = (1.0 - ps) * t + ps * (1.0 - t)
    fw = (alpha * t + (1.0 - alpha) * (1.0 - t)) * pt ** gamma
    bce = jnp.maximum(p, 0.0) - p * t + jnp.log1p(jnp.exp(-jnp.abs(p)))
    return bce * fw


if __name__ == "__main__":
    key = jax.random.PRNGKey(0)
    k1, k2, k3, k4, k5 = jax.random.split(key, 5)

    module = FocalLossPallas(gamma=2.0, alpha=0.25, reduction='mean', loss_weight=1.0)

    # Case 1: small (N, C) classification shape -> single full-array block.
    N, C = 8, 32
    pred = jax.random.normal(k1, (N, C), jnp.float32) * 2.0
    target = (jax.random.uniform(k2, (N, C)) < 0.3).astype(jnp.float32)

    loss_mean = jax.block_until_ready(module(pred, target))
    loss_none = jax.block_until_ready(module(pred, target, reduction_override='none'))
    loss_sum = jax.block_until_ready(module(pred, target, reduction_override='sum'))

    ref_elem = _reference_jnp(pred, target)
    assert loss_none.shape == (C, N), loss_none.shape
    assert jnp.allclose(loss_none, ref_elem, rtol=5e-4, atol=1e-6), "elementwise mismatch"
    assert jnp.allclose(loss_mean, ref_elem.mean(), rtol=5e-4, atol=1e-6), \
        (loss_mean, ref_elem.mean())
    assert jnp.allclose(loss_sum, ref_elem.sum(), rtol=5e-4, atol=1e-5), \
        (loss_sum, ref_elem.sum())

    # Case 2: forced multi-block grid with a ragged last block (exercises the
    # pl.when-gated tail mask, the vreg-add partial-sum path, and output clipping).
    R, L = 160, 128
    pred2 = jax.random.normal(k3, (R, L), jnp.float32) * 3.0
    target2 = (jax.random.uniform(k4, (R, L)) < 0.25).astype(jnp.float32)
    ref2 = _reference_jnp(pred2, target2)

    elem2 = _focal_elementwise_pallas(pred2, target2, 2.0, 0.25,
                                      lanes=128, max_block_rows=64)
    sum2, cnt2 = _focal_sum_pallas(pred2, target2, 2.0, 0.25,
                                   lanes=128, max_block_rows=64)
    jax.block_until_ready((elem2, sum2))
    assert cnt2 == R * L
    assert jnp.allclose(jnp.swapaxes(elem2, 0, 1), ref2, rtol=5e-4, atol=1e-6), \
        "tiled elementwise mismatch"
    assert jnp.allclose(sum2, ref2.sum(), rtol=1e-3, atol=1e-3), (sum2, ref2.sum())

    # Case 2 via the module (auto tiling) + weighted sum path.
    mean2 = jax.block_until_ready(module(pred2, target2))
    assert jnp.allclose(mean2, ref2.mean(), rtol=1e-3, atol=1e-6), (mean2, ref2.mean())

    w2 = jax.random.uniform(k5, (L,), jnp.float32)
    wsum2 = jax.block_until_ready(
        module(pred2, target2, weight=w2, reduction_override='sum'))
    ref_wsum2 = (ref2 * w2.reshape(-1, 1)).sum()
    assert jnp.allclose(wsum2, ref_wsum2, rtol=1e-3, atol=1e-3), (wsum2, ref_wsum2)

    print("KERNEL_OK")
</pallas_src>

<mosaic_0001>
module attributes {stable_mosaic.version = 11 : i64} {
  func.func @_focal_psum_kernel(%arg0: i32, %arg1: memref<1x256xf32, #tpu.memory_space<vmem>>, %arg2: memref<1x256xf32, #tpu.memory_space<vmem>>, %arg3: memref<8x128xf32, #tpu.memory_space<vmem>>) attributes {dimension_semantics = [#tpu.dimension_semantics<parallel>], iteration_bounds = array<i64: 1>, scalar_prefetch = 0 : i64, scratch_operands = 0 : i64, tpu.core_type = #tpu.core_type<tc>, window_params = [{transform_indices = @transform_0, window_bounds = array<i64: 1, 256>}, {transform_indices = @transform_1, window_bounds = array<i64: 1, 256>}, {transform_indices = @transform_2, window_bounds = array<i64: 8, 128>}]} {
    %c0 = arith.constant 0 : index
    %c0_0 = arith.constant 0 : index
    %0 = vector.load %arg1[%c0, %c0_0] : memref<1x256xf32, #tpu.memory_space<vmem>>, vector<1x256xf32>
    %c0_1 = arith.constant 0 : index
    %c0_2 = arith.constant 0 : index
    %1 = vector.load %arg2[%c0_1, %c0_2] : memref<1x256xf32, #tpu.memory_space<vmem>>, vector<1x256xf32>
    %2 = math.absf %0 : vector<1x256xf32>
    %cst = arith.constant 0.000000e+00 : f32
    %3 = vector.broadcast %cst : f32 to vector<1x256xf32>
    %4 = arith.subf %3, %2 : vector<1x256xf32>
    %5 = math.exp %4 : vector<1x256xf32>
    %cst_3 = arith.constant 1.000000e+00 : f32
    %6 = vector.broadcast %cst_3 : f32 to vector<1x256xf32>
    %7 = arith.addf %6, %5 : vector<1x256xf32>
    %cst_4 = arith.constant 1.000000e+00 : f32
    %8 = vector.broadcast %cst_4 : f32 to vector<1x256xf32>
    %9 = arith.divf %8, %7 : vector<1x256xf32>
    %cst_5 = arith.constant 0.000000e+00 : f32
    %10 = vector.broadcast %cst_5 : f32 to vector<1x256xf32>
    %11 = arith.cmpf oge, %0, %10 : vector<1x256xf32>
    %12 = arith.mulf %5, %9 : vector<1x256xf32>
    %13 = arith.select %11, %9, %12 : vector<1x256xi1>, vector<1x256xf32>
    %cst_6 = arith.constant 0.000000e+00 : f32
    %14 = vector.broadcast %cst_6 : f32 to vector<1x256xf32>
    %15 = arith.maximumf %0, %14 : vector<1x256xf32>
    %16 = arith.mulf %0, %1 : vector<1x256xf32>
    %17 = arith.subf %15, %16 : vector<1x256xf32>
    %18 = math.log1p %5 : vector<1x256xf32>
    %19 = arith.addf %17, %18 : vector<1x256xf32>
    %cst_7 = arith.constant 1.000000e+00 : f32
    %20 = vector.broadcast %cst_7 : f32 to vector<1x256xf32>
    %21 = arith.subf %20, %13 : vector<1x256xf32>
    %22 = arith.mulf %21, %1 : vector<1x256xf32>
    %cst_8 = arith.constant 1.000000e+00 : f32
    %23 = vector.broadcast %cst_8 : f32 to vector<1x256xf32>
    %24 = arith.subf %23, %1 : vector<1x256xf32>
    %25 = arith.mulf %13, %24 : vector<1x256xf32>
    %26 = arith.addf %22, %25 : vector<1x256xf32>
    %27 = arith.mulf %26, %26 : vector<1x256xf32>
    %cst_9 = arith.constant -5.000000e-01 : f32
    %28 = vector.broadcast %cst_9 : f32 to vector<1x256xf32>
    %29 = arith.mulf %28, %1 : vector<1x256xf32>
    %cst_10 = arith.constant 7.500000e-01 : f32
    %30 = vector.broadcast %cst_10 : f32 to vector<1x256xf32>
    %31 = arith.addf %30, %29 : vector<1x256xf32>
    %32 = arith.mulf %19, %31 : vector<1x256xf32>
    %33 = arith.mulf %32, %27 : vector<1x256xf32>
    %34 = vector.shape_cast %33 : vector<1x256xf32> to vector<1x1x256xf32>
    %cst_11 = arith.constant dense<0.000000e+00> : vector<1xf32>
    %35 = vector.multi_reduction <add>, %34, %cst_11 [1, 2] : vector<1x1x256xf32> to vector<1xf32>
    %36 = vector.shape_cast %35 : vector<1xf32> to vector<1x1x1xf32>
    %37 = vector.extract %36[0, 0, 0] : f32 from vector<1x1x1xf32>
    %38 = tpu.iota {dimensions = array<i32: 0>} : vector<8x128xi32>
    %39 = tpu.iota {dimensions = array<i32: 1>} : vector<8x128xi32>
    %c0_i32 = arith.constant 0 : i32
    %40 = vector.broadcast %c0_i32 : i32 to vector<8x128xi32>
    %41 = arith.cmpi eq, %38, %40 : vector<8x128xi32>
    %c0_i32_12 = arith.constant 0 : i32
    %42 = vector.broadcast %c0_i32_12 : i32 to vector<8x128xi32>
    %43 = arith.cmpi eq, %39, %42 : vector<8x128xi32>
    %44 = arith.andi %41, %43 : vector<8x128xi1>
    %cst_13 = arith.constant 0.000000e+00 : f32
    %45 = vector.broadcast %37 : f32 to vector<8x128xf32>
    %46 = vector.broadcast %cst_13 : f32 to vector<8x128xf32>
    %47 = arith.select %44, %45, %46 : vector<8x128xi1>, vector<8x128xf32>
    %c0_14 = arith.constant 0 : index
    %c0_15 = arith.constant 0 : index
    %48 = vector.load %arg3[%c0_14, %c0_15] : memref<8x128xf32, #tpu.memory_space<vmem>>, vector<8x128xf32>
    tpu.vector_store %arg3[%c0_14, %c0_15], %47 {strides = array<i32>} : memref<8x128xf32, #tpu.memory_space<vmem>>, vector<8x128xf32>,
    return
  }
  func.func @transform_0(%arg0: i32) -> (i32, i32) {
    %c0_i32 = arith.constant 0 : i32
    %c0_i32_0 = arith.constant 0 : i32
    return %arg0, %c0_i32 : i32, i32
  }
  func.func @transform_1(%arg0: i32) -> (i32, i32) {
    %c0_i32 = arith.constant 0 : i32
    %c0_i32_0 = arith.constant 0 : i32
    return %arg0, %c0_i32 : i32, i32
  }
  func.func @transform_2(%arg0: i32) -> (i32, i32) {
    %c0_i32 = arith.constant 0 : i32
    %c0_i32_0 = arith.constant 0 : i32
    return %arg0, %c0_i32 : i32, i32
  }
}

</mosaic_0001>

<bundles_post_ra>
// kernel: tpu_custom_call.1
= control target key start
LH: loop header
LB: loop body
LE: loop exit
PB: predicated region body
PF: predicated region fallthrough
CT: control target
= control target key end

     0   :  { %7 = vsyncpa [#allocation3], 0  ;;  %s210_s0 = inlined_call_operand.hbm [shape: f32[1,256], index: 0, kind: input, shape index: {}]   ;;  %s211_s1 = inlined_call_operand.vmem [shape: f32[1,256], index: 1, kind: input, shape index: {}]   ;;  %s212_s2 = inlined_call_operand.hbm [shape: f32[8,128], index: 2, kind: output, shape index: {}]  }
   0x1   :  { %8 = vsyncpa [#allocation4], 0  ;;  %s166_s9 = smov [#allocation2]   ;;  %s118_s13 = scalar_lea.hbm %s210_s0, 32 }
   0x2   :  { %s15_s10 = sshll.u32 %s166_s9, 4  ;;  %p119_p0 = scmp.ne.s32.totalorder %s210_s0, %s118_s13  ;;  %s16_s10 = int_to_ptr.vmem [resolvable:$true] %s15_s10 }
   0x3   :  { %p122_p1 = scmp.lt.u32.totalorder %s118_s13, %s210_s0 }
   0x5   :  { %p124_p2 = pnand %p122_p1, %p119_p0 }
   0x7   :  { %127 = shalt.err (!%p124_p2)
}
   0x8   :  { %s128_s18 = scalar_lea.vmem %s16_s10, 32  ;;  %p133_p4 = scmp.lt.s32.totalorder %s16_s10, %s16_s10 }
   0x9   :  { %p129_p3 = scmp.ne.s32.totalorder %s16_s10, %s128_s18  ;;  %p134_p5 = scmp.lt.s32.totalorder %s128_s18, %s128_s18 }
   0xb   :  { %p135_p6 = por %p134_p5, %p133_p4 }
   0xd   :  { %p136_p7 = pnand %p135_p6, %p129_p3 }
   0xf   :  { %139 = shalt.err (!%p136_p7)
}
  0x10   :  { %18 = dma.hbm_to_vmem [thread:$0]  %s210_s0, 32, %s16_s10, [#allocation3]  }
  0x11   :  { %162 = dma.done.wait [#allocation3], 32  }
  0x12   :  { %163 = vsyncadd [#allocation3], 4294967264  ;;  %v24_v0 = vld [vmem:[#allocation2] sm:$0x3]  ;;  %v60_v20 = vlaneseq  ;;  %vm70_vm2 = vcmask 1040384   ;;  %s167_s0 = smov [#allocation5]  }
  0x13   :  { %v26_v1 = vand.u32 2147483647, %v24_v0  ;;  %v25_v7 = vld [vmem:[%s211_s1] sm:$0x3]  ;;  %v36_v9 = vmax.f32 %v24_v0, 0.0  ;;  %vm33_vm0 = vcmp.ge.f32.partialorder %v24_v0, 0.0 }
  0x14   :  { %v37_v10 = vmul.f32 %v25_v7, %v24_v0  ;;  %v51_v14 = vsub.f32 1.0, %v25_v7  ;;  %v55_v15 = vmul.f32 -0.5, %v25_v7  ;;  %v61_v28 = vshrl.u32 %v60_v20, 7  ;;  %s99_s1 = sshll.u32 %s167_s0, 4  ;;  %s100_s1 = int_to_ptr.vmem [resolvable:$true] %s99_s1 }
  0x15   :  { %v27_v2 = vsub.f32 0.0, %v26_v1  ;;  %v86_v47 = vand.u32 127, %v60_v20  ;;  %s140_s24 = scalar_lea.vmem %s100_s1, 128  ;;  %p145_p9 = scmp.lt.s32.totalorder %s100_s1, %s100_s1 }
  0x16   :  { %v38_v18 = vsub.f32 %v36_v9, %v37_v10  ;;  %v56_v25 = vadd.f32 0.75, %v55_v15  ;;  %v62_v32 = vsub.s32 0, %v61_v28  ;;  %v66_v33 = vsub.s32 1, %v61_v28  ;;  %p141_p8 = scmp.ne.s32.totalorder %s100_s1, %s140_s24  ;;  %p146_p10 = scmp.lt.s32.totalorder %s140_s24, %s140_s24 }
  0x17   :  { %v28_v3 = vmul.f32 1.442695, %v27_v2  ;;  %vm87_vm3 = vcmp.eq.s32.totalorder %v61_v28, 0  ;;  %vm88_vm4 = vcmp.eq.s32.totalorder %v86_v47, 0 }
  0x18   :  { %vm89_vm5 = vmand %vm87_vm3, %vm88_vm4  ;;  %p147_p11 = por %p146_p10, %p145_p9 }
  0x19   :  { %112 = vpow2.f32 %v28_v3 }
  0x1a   :  { %p148_p12 = pnand %p147_p11, %p141_p8 }
  0x23   :  { %v113_v4 = vpop.eup %112 }
  0x24   :  { %v30_v5 = vadd.f32 1.0, %v113_v4  ;;  %v42_v6 = vmul.f32 -0.5, %v113_v4  ;;  %v45_v11 = vand.u32 2147483647, %v113_v4 }
  0x26   :  { %114 = vrcp.f32 %v30_v5  ;;  %v43_v8 = vadd.f32 1.0, %v42_v6  ;;  %vm46_vm1 = vcmp.lt.f32.partialorder %v45_v11, 0.0004427343 }
  0x27   :  { %116 = vlog2.f32 %v30_v5 }
  0x28   :  { %v44_v13 = vmul.f32 %v113_v4, %v43_v8 }
  0x30   :  { %v115_v12 = vpop.eup %114 }
  0x31   :  { %v117_v16 = vpop.eup %116  ;;  %v34_v17 = vmul.f32 %v115_v12, %v113_v4 }
  0x32   :  { %v41_v19 = vmul.f32 0.6931472, %v117_v16 }
  0x33   :  { %v35_v21 = vsel %vm33_vm0, %v115_v12, %v34_v17 }
  0x34   :  { %v47_v22 = vsel %vm46_vm1, %v44_v13, %v41_v19  ;;  %v49_v23 = vsub.f32 1.0, %v35_v21  ;;  %v52_v24 = vmul.f32 %v51_v14, %v35_v21 }
  0x35   :  { %v48_v26 = vadd.f32 %v47_v22, %v38_v18 }
  0x36   :  { %v50_v27 = vmul.f32 %v49_v23, %v25_v7 }
  0x37   :  { %v57_v30 = vmul.f32 %v56_v25, %v48_v26 }
  0x38   :  { %v53_v29 = vadd.f32 %v52_v24, %v50_v27 }
  0x3a   :  { %v54_v31 = vmul.f32 %v53_v29, %v53_v29 }
  0x3c   :  { %v58_v34 = vmul.f32 %v57_v30, %v54_v31 }
  0x3e   :  { %v63_v35 = vrot.slane %v58_v34, %v62_v32  ;;  %v67_v36 = vrot.slane %v58_v34, %v66_v33 }
  0x40   :  { %v71_v37 = vsel %vm70_vm2, %v63_v35, 0.0  ;;  %v72_v38 = vsel %vm70_vm2, %v67_v36, 0.0 }
  0x41   :  { %v73_v39 = vadd.f32 %v72_v38, %v71_v37 }
  0x43   :  { %74 = vadd.xlane.f32.xlu0 %v73_v39 }
  0xd0   :  { %v75_v40 = vpop.xlane.xlu0 %74 }
  0xd1   :  { %v76_v41 = vrot.slane %v75_v40, 4 }
  0xd3   :  { %v77_v42 = vadd.f32 %v76_v41, %v75_v40 }
  0xd5   :  { %v78_v43 = vrot.slane %v77_v42, 2 }
  0xd7   :  { %v79_v44 = vadd.f32 %v78_v43, %v77_v42 }
  0xd9   :  { %v80_v45 = vrot.slane %v79_v44, 1 }
  0xdb   :  { %v81_v46 = vadd.f32 %v80_v45, %v79_v44 }
  0xdd   :  { %108 = vpush %v81_v46 }
 0x10e   :  { %s109_s23 = spop %108 }
 0x10f   :  { %v90_v48 = vstv %s109_s23 }
 0x110   :  { %v91_v49 = vsel %vm89_vm5, %v90_v48, 0.0 }
 0x111   :  { %92 = vst [vmem:[#allocation5] sm:$0xff] %v91_v49 }
 0x112   :  { %151 = shalt.err (!%p148_p12)
}
 0x113   :  { %s152_s27 = scalar_lea.hbm %s212_s2, 128 }
 0x114   :  { %p153_p13 = scmp.ne.s32.totalorder %s212_s2, %s152_s27  ;;  %p156_p0 = scmp.lt.u32.totalorder %s152_s27, %s212_s2 }
 0x116   :  { %p158_p1 = pnand %p156_p0, %p153_p13 }
 0x118   :  { %161 = shalt.err (!%p158_p1)
}
 0x119   :  { %102 = dma.vmem_to_hbm [thread:$0]  %s100_s1, 128, %s212_s2, [#allocation4]  }
 0x11a   :  { %164 = dma.done.wait [#allocation4], 128  }
 0x11b   :  { %165 = vsyncadd [#allocation4], 4294967168 }
 0x11c   :  { %106 = vsyncpa [#allocation3], 1 }
 0x11d   :  { %107 = vsyncpa [#allocation4], 1 }

</bundles_post_ra>
